<compile_context>
chip_gen: v6e
topology: v6e:2x2x1
jax: 0.10.0
libtpu: 0.0.40
codegen_flags: <defaults>
</compile_context>

<pallas_src>
import math
import jax
import jax.numpy as jnp
from jax import lax
from jax.experimental import pallas as pl
from jax.experimental.pallas import tpu as pltpu

SEQ = 96      # sequence length
DIM = 64      # model / head dim
PAD = 128     # per-projection lane-aligned width
XAUG = 128    # augmented x width (cols 0..63 = x, col 64 = 1.0 bias lane, rest 0)


def _attn_kernel(x_ref, wqk_ref, wv_ref, mask_ref, o_ref):
    x = x_ref[...]                                              # (SEQ, XAUG)

    # Fused Q/K projection; bias folded in via the ones column of x.
    # (96,128) @ (128,256) -> (96,256), f32 accumulation.
    qk = jnp.dot(x, wqk_ref[...], preferred_element_type=jnp.float32)
    q = qk[:, :PAD]        # softmax scale already folded into these columns
    k = qk[:, PAD:]        # padding columns (64..127) are exactly zero

    # Scores: contract feature dims of q and k directly (no materialized k.T).
    s = lax.dot_general(q, k, dimension_numbers=(((1,), (1,)), ((), ())),
                        preferred_element_type=jnp.float32)    # (SEQ, SEQ)

    # Additive mask (the attn_mask Parameter, passed in — not baked).
    s = s + mask_ref[...]

    # Numerically stable softmax numerator.
    m = jnp.max(s, axis=-1, keepdims=True)
    e = jnp.exp(s - m)

    # V projection issued here so it overlaps the softmax EUP/VPU work.
    v = jnp.dot(x, wv_ref[...], preferred_element_type=jnp.float32)  # (SEQ, PAD)

    # Un-normalized weighted sum first; normalization is off the MXU path.
    pv = jnp.dot(e, v, preferred_element_type=jnp.float32)           # (SEQ, PAD)

    # Denominator via EUP reciprocal + one Newton step (keeps 1e-4 tolerance).
    denom = jnp.sum(e, axis=-1, keepdims=True)
    inv = pl.reciprocal(denom, approx=True)
    inv = inv * (2.0 - denom * inv)

    # Lane-dense (96,128) store; columns 64..127 are zero.
    o_ref[...] = (pv * inv).astype(o_ref.dtype)


def make_attention_forward(wq, bq, wk, bk, wv, bv, attn_mask):
    """Precompute fused/padded parameters ONCE; return a jitted forward(x).

    Weights are (in, out) layout, biases (DIM,), attn_mask (1, SEQ, SEQ).
    """
    scale = 1.0 / math.sqrt(DIM)

    def pad_aug(w, b, s=1.0):
        # (DIM, DIM) weight + (DIM,) bias -> (XAUG, PAD):
        #   rows 0..63 = w*s, row 64 = b*s (matches the ones column of x_aug),
        #   everything else exactly zero (keeps padded q/k/v lanes zero).
        wp = jnp.zeros((XAUG, PAD), jnp.float32)
        wp = wp.at[:DIM, :DIM].set(jnp.asarray(w, jnp.float32) * s)
        wp = wp.at[DIM, :DIM].set(jnp.asarray(b, jnp.float32) * s)
        return wp

    wqk = jnp.concatenate([pad_aug(wq, bq, scale), pad_aug(wk, bk)], axis=1)  # (128, 256)
    wv_p = pad_aug(wv, bv)                                                    # (128, 128)
    mask2 = jnp.asarray(attn_mask, jnp.float32).reshape(SEQ, SEQ)             # (96, 96)

    # Constant lane-padding block: first column is the bias selector (1.0).
    pad_block = jnp.zeros((SEQ, XAUG - DIM), jnp.float32).at[:, 0].set(1.0)

    vmem = pl.BlockSpec(memory_space=pltpu.MemorySpace.VMEM)
    kernel = pl.pallas_call(
        _attn_kernel,
        out_shape=jax.ShapeDtypeStruct((SEQ, PAD), jnp.float32),
        in_specs=[vmem, vmem, vmem, vmem],
        out_specs=vmem,
        cost_estimate=pl.CostEstimate(
            flops=2 * SEQ * XAUG * (2 * PAD) + 2 * SEQ * XAUG * PAD
                  + 2 * SEQ * SEQ * PAD + 2 * SEQ * SEQ * PAD,
            transcendentals=SEQ * SEQ + SEQ,
            bytes_accessed=4 * (SEQ * XAUG + XAUG * 3 * PAD + SEQ * SEQ + SEQ * PAD)),
    )

    @jax.jit
    def forward(x):
        # Only cheap, jit-fused ops around the single pallas_call.
        x2 = x.reshape(SEQ, DIM)                               # batch=1 per spec
        x_aug = jnp.concatenate([x2, pad_block], axis=1)       # (SEQ, XAUG)
        out = kernel(x_aug, wqk, wv_p, mask2)                  # (SEQ, PAD)
        return out[None, :, :DIM]                              # (1, SEQ, DIM)

    return forward


def _reference(x, wq, bq, wk, bk, wv, bv, mask):
    q = x @ wq + bq
    k = x @ wk + bk
    v = x @ wv + bv
    qk = jnp.einsum("bqd,bkd->bqk", q, k) / math.sqrt(DIM) + mask
    w = jax.nn.softmax(qk, axis=-1)
    return jnp.einsum("bqk,bkd->bqd", w, v)


if __name__ == "__main__":
    key = jax.random.PRNGKey(0)
    kx, k1, k2, k3, k4, k5, k6 = jax.random.split(key, 7)

    # Input, same shape as the PyTorch script: (1, 96, 64).
    x1 = jax.random.normal(kx, (1, SEQ, DIM), dtype=jnp.float32)

    # Deterministic parameter init (nn.Linear-shaped, (in, out) layout).
    lim = 1.0 / math.sqrt(DIM)
    wq = jax.random.uniform(k1, (DIM, DIM), minval=-lim, maxval=lim)
    bq = jax.random.uniform(k2, (DIM,), minval=-lim, maxval=lim)
    wk = jax.random.uniform(k3, (DIM, DIM), minval=-lim, maxval=lim)
    bk = jax.random.uniform(k4, (DIM,), minval=-lim, maxval=lim)
    wv = jax.random.uniform(k5, (DIM, DIM), minval=-lim, maxval=lim)
    bv = jax.random.uniform(k6, (DIM,), minval=-lim, maxval=lim)

    # attn_mask Parameter init value (tril of ones), passed to the kernel.
    attn_mask = jnp.tril(jnp.ones((1, SEQ, SEQ), dtype=jnp.float32))

    forward = make_attention_forward(wq, bq, wk, bk, wv, bv, attn_mask)
    out = forward(x1)
    jax.block_until_ready(out)

    ref = _reference(x1, wq, bq, wk, bk, wv, bv, attn_mask)
    assert out.shape == (1, SEQ, DIM)
    assert jnp.allclose(out, ref, atol=1e-4, rtol=1e-4), "mismatch vs reference"
    print("KERNEL_OK")
</pallas_src>

<mosaic_0001>
module attributes {stable_mosaic.version = 11 : i64} {
  func.func @_attn_kernel(%arg0: memref<96x128xf32, #tpu.memory_space<vmem>>, %arg1: memref<128x256xf32, #tpu.memory_space<vmem>>, %arg2: memref<128x128xf32, #tpu.memory_space<vmem>>, %arg3: memref<96x96xf32, #tpu.memory_space<vmem>>, %arg4: memref<96x128xf32, #tpu.memory_space<vmem>>) attributes {dimension_semantics = [], scalar_prefetch = 0 : i64, scratch_operands = 0 : i64, tpu.core_type = #tpu.core_type<tc>} {
    %c0 = arith.constant 0 : index
    %c0_0 = arith.constant 0 : index
    %0 = vector.load %arg0[%c0, %c0_0] : memref<96x128xf32, #tpu.memory_space<vmem>>, vector<96x128xf32>
    %c0_1 = arith.constant 0 : index
    %c0_2 = arith.constant 0 : index
    %1 = vector.load %arg1[%c0_1, %c0_2] : memref<128x256xf32, #tpu.memory_space<vmem>>, vector<128x256xf32>
    %cst = arith.constant dense<0.000000e+00> : vector<96x256xf32>
    %2 = tpu.matmul %0, %1, %cst {dimension_numbers = #tpu.dot_dimension_numbers<[1], [0], [0], [1], [0, 0, 1, 1], [], []>} : vector<96x128xf32>, vector<128x256xf32>, vector<96x256xf32> -> vector<96x256xf32>
    %3 = vector.extract_strided_slice %2 {offsets = [0, 0], sizes = [96, 128], strides = [1, 1]} : vector<96x256xf32> to vector<96x128xf32>
    %4 = vector.extract_strided_slice %2 {offsets = [0, 128], sizes = [96, 128], strides = [1, 1]} : vector<96x256xf32> to vector<96x128xf32>
    %cst_3 = arith.constant dense<0.000000e+00> : vector<96x96xf32>
    %5 = tpu.matmul %3, %4, %cst_3 {dimension_numbers = #tpu.dot_dimension_numbers<[1], [1], [0], [0], [0, 0, 1, 0], [], []>} : vector<96x128xf32>, vector<96x128xf32>, vector<96x96xf32> -> vector<96x96xf32>
    %c0_4 = arith.constant 0 : index
    %c0_5 = arith.constant 0 : index
    %6 = vector.load %arg3[%c0_4, %c0_5] : memref<96x96xf32, #tpu.memory_space<vmem>>, vector<96x96xf32>
    %7 = arith.addf %5, %6 : vector<96x96xf32>
    %cst_6 = arith.constant dense<0xFF800000> : vector<96xf32>
    %8 = vector.multi_reduction <maximumf>, %7, %cst_6 [1] : vector<96x96xf32> to vector<96xf32>
    %9 = vector.shape_cast %8 : vector<96xf32> to vector<96x1xf32>
    %10 = vector.broadcast %9 : vector<96x1xf32> to vector<96x96xf32>
    %11 = arith.subf %7, %10 : vector<96x96xf32>
    %12 = math.exp %11 : vector<96x96xf32>
    %c0_7 = arith.constant 0 : index
    %c0_8 = arith.constant 0 : index
    %13 = vector.load %arg2[%c0_7, %c0_8] : memref<128x128xf32, #tpu.memory_space<vmem>>, vector<128x128xf32>
    %cst_9 = arith.constant dense<0.000000e+00> : vector<96x128xf32>
    %14 = tpu.matmul %0, %13, %cst_9 {dimension_numbers = #tpu.dot_dimension_numbers<[1], [0], [0], [1], [0, 0, 1, 1], [], []>} : vector<96x128xf32>, vector<128x128xf32>, vector<96x128xf32> -> vector<96x128xf32>
    %cst_10 = arith.constant dense<0.000000e+00> : vector<96x128xf32>
    %15 = tpu.matmul %12, %14, %cst_10 {dimension_numbers = #tpu.dot_dimension_numbers<[1], [0], [0], [1], [0, 0, 1, 1], [], []>} : vector<96x96xf32>, vector<96x128xf32>, vector<96x128xf32> -> vector<96x128xf32>
    %cst_11 = arith.constant dense<0.000000e+00> : vector<96xf32>
    %16 = vector.multi_reduction <add>, %12, %cst_11 [1] : vector<96x96xf32> to vector<96xf32>
    %17 = vector.shape_cast %16 : vector<96xf32> to vector<96x1xf32>
    %18 = tpu.reciprocal %17 {approx = true} : vector<96x1xf32> -> vector<96x1xf32>
    %19 = arith.mulf %17, %18 : vector<96x1xf32>
    %cst_12 = arith.constant 2.000000e+00 : f32
    %20 = vector.broadcast %cst_12 : f32 to vector<96x1xf32>
    %21 = arith.subf %20, %19 : vector<96x1xf32>
    %22 = arith.mulf %18, %21 : vector<96x1xf32>
    %23 = vector.broadcast %22 : vector<96x1xf32> to vector<96x128xf32>
    %24 = arith.mulf %15, %23 : vector<96x128xf32>
    %c0_13 = arith.constant 0 : index
    %c0_14 = arith.constant 0 : index
    %25 = vector.load %arg4[%c0_13, %c0_14] : memref<96x128xf32, #tpu.memory_space<vmem>>, vector<96x128xf32>
    tpu.vector_store %arg4[%c0_13, %c0_14], %24 {strides = array<i32>} : memref<96x128xf32, #tpu.memory_space<vmem>>, vector<96x128xf32>,
    return
  }
}

</mosaic_0001>

<bundles_post_ra>
// kernel: forward.1
= control target key start
LH: loop header
LB: loop body
LE: loop exit
PB: predicated region body
PF: predicated region fallthrough
CT: control target
= control target key end

     0   :  { %9 = vsyncpa [#allocation3], 0  ;;  %s1133_s15 = smov [#allocation2]   ;;  %s1494_s0 = inlined_call_operand.vmem [shape: f32[96,128], index: 0, kind: input, shape index: {}]   ;;  %s1495_s1 = inlined_call_operand.vmem [shape: f32[128,256], index: 1, kind: input, shape index: {}]   ;;  %s1496_s2 = inlined_call_operand.vmem [shape: f32[128,128], index: 2, kind: input, shape index: {}]   ;;  %s1497_s3 = inlined_call_operand.hbm [shape: f32[96,96], index: 3, kind: input, shape index: {}]   ;;  %s1498_s4 = inlined_call_operand.vmem [shape: f32[96,128], index: 4, kind: output, shape index: {}]  }
   0x1   :  { %s21_s16 = sshll.u32 %s1133_s15, 4  ;;  %s22_s16 = int_to_ptr.vmem [resolvable:$true] %s21_s16 }
   0x2   :  { %s1119_s17 = scalar_lea.vmem %s22_s16, 1536  ;;  %p1124_p1 = scmp.lt.s32.totalorder %s22_s16, %s22_s16 }
   0x3   :  { %p1120_p0 = scmp.ne.s32.totalorder %s22_s16, %s1119_s17  ;;  %p1125_p2 = scmp.lt.s32.totalorder %s1119_s17, %s1119_s17 }
   0x5   :  { %p1126_p3 = por %p1125_p2, %p1124_p1 }
   0x7   :  { %p1127_p4 = pnand %p1126_p3, %p1120_p0 }
   0x9   :  { %1130 = shalt.err (!%p1127_p4)
}
   0xa   :  { %s1134_s18 = smov 128   ;;  %s1135_s19 = smov 8  }
   0xb   :  { %27 = dma.hbm_to_vmem [thread:$0]  %s1497_s3, 1536, %s22_s16, [#allocation3], %s1134_s18, %s1134_s18, %s1135_s19  }
   0xc   :  { %1131 = dma.done.wait [#allocation3], 1536  }
   0xd   :  { %1132 = vsyncadd [#allocation3], 4294965760  ;;  %v1136_v0 = vmov 0.0   ;;  %v74_v1 = vld [vmem:[%s1495_s1 + $0xf8] sm:$0xff]  ;;  %v73_v2 = vld [vmem:[%s1495_s1 + $0xf0] sm:$0xff]  ;;  %vm349_vm0 = vcmask 785408  }
   0xe   :  { %139 = vmatprep.mubr.f32.mxu0 %v1136_v0  ;;  %v72_v3 = vld [vmem:[%s1495_s1 + $0xe8] sm:$0xff]  ;;  %75 = vmatprep.subr.mxu0 %v74_v1  ;;  %v71_v4 = vld [vmem:[%s1495_s1 + $0xe0] sm:$0xff]  ;;  %v70_v5 = vld [vmem:[%s1495_s1 + $0xd8] sm:$0xff] }
   0xf   :  { %76 = vmatpush1.msra.mxu0 %v73_v2  ;;  %v69_v6 = vld [vmem:[%s1495_s1 + $0xd0] sm:$0xff]  ;;  %v68_v7 = vld [vmem:[%s1495_s1 + $0xc8] sm:$0xff]  ;;  %v67_v8 = vld [vmem:[%s1495_s1 + $0xc0] sm:$0xff] }
  0x10   :  { %77 = vmatprep.subr.mxu0 %v72_v3  ;;  %v66_v9 = vld [vmem:[%s1495_s1 + $0xb8] sm:$0xff]  ;;  %v65_v10 = vld [vmem:[%s1495_s1 + $0xb0] sm:$0xff]  ;;  %v64_v11 = vld [vmem:[%s1495_s1 + $0xa8] sm:$0xff] }
  0x11   :  { %78 = vmatpush1.msra.mxu0 %v71_v4  ;;  %v63_v12 = vld [vmem:[%s1495_s1 + $0xa0] sm:$0xff]  ;;  %v62_v13 = vld [vmem:[%s1495_s1 + $0x98] sm:$0xff]  ;;  %v61_v14 = vld [vmem:[%s1495_s1 + $0x90] sm:$0xff] }
  0x12   :  { %79 = vmatprep.subr.mxu0 %v70_v5  ;;  %v60_v15 = vld [vmem:[%s1495_s1 + $0x88] sm:$0xff]  ;;  %v59_v16 = vld [vmem:[%s1495_s1 + $0x80] sm:$0xff]  ;;  %v58_v17 = vld [vmem:[%s1495_s1 + $0x78] sm:$0xff] }
  0x13   :  { %80 = vmatpush1.msra.mxu0 %v69_v6  ;;  %v57_v18 = vld [vmem:[%s1495_s1 + $0x70] sm:$0xff]  ;;  %v56_v19 = vld [vmem:[%s1495_s1 + $0x68] sm:$0xff]  ;;  %v55_v20 = vld [vmem:[%s1495_s1 + $0x60] sm:$0xff] }
  0x14   :  { %81 = vmatprep.subr.mxu0 %v68_v7  ;;  %v54_v21 = vld [vmem:[%s1495_s1 + $0x58] sm:$0xff]  ;;  %v53_v22 = vld [vmem:[%s1495_s1 + $0x50] sm:$0xff]  ;;  %v52_v23 = vld [vmem:[%s1495_s1 + $0x48] sm:$0xff] }
  0x15   :  { %82 = vmatpush1.msra.mxu0 %v67_v8  ;;  %v51_v24 = vld [vmem:[%s1495_s1 + $0x40] sm:$0xff]  ;;  %v50_v25 = vld [vmem:[%s1495_s1 + $0x38] sm:$0xff]  ;;  %v49_v26 = vld [vmem:[%s1495_s1 + $0x30] sm:$0xff] }
  0x16   :  { %83 = vmatprep.subr.mxu0 %v66_v9  ;;  %v48_v27 = vld [vmem:[%s1495_s1 + $0x28] sm:$0xff]  ;;  %v47_v28 = vld [vmem:[%s1495_s1 + $0x20] sm:$0xff]  ;;  %v46_v29 = vld [vmem:[%s1495_s1 + $0x18] sm:$0xff] }
  0x17   :  { %84 = vmatpush1.msra.mxu0 %v65_v10  ;;  %v45_v30 = vld [vmem:[%s1495_s1 + $0x10] sm:$0xff]  ;;  %v44_v31 = vld [vmem:[%s1495_s1 + $0x8] sm:$0xff]  ;;  %v43_v32 = vld [vmem:[%s1495_s1] sm:$0xff] }
  0x18   :  { %85 = vmatprep.subr.mxu0 %v64_v11  ;;  %v31_v33 = vld [vmem:[%s1494_s0] sm:$0xff]  ;;  %v1269_v34 = vld [vmem:[%s1494_s0 + $0x8] sm:$0xff]  ;;  %v1276_v35 = vld [vmem:[%s1494_s0 + $0x10] sm:$0xff] }
  0x19   :  { %86 = vmatpush1.msra.mxu0 %v63_v12  ;;  %v1283_v36 = vld [vmem:[%s1494_s0 + $0x18] sm:$0xff]  ;;  %v1290_v37 = vld [vmem:[%s1494_s0 + $0x20] sm:$0xff]  ;;  %v1297_v38 = vld [vmem:[%s1494_s0 + $0x28] sm:$0xff] }
  0x1a   :  { %87 = vmatprep.subr.mxu0 %v62_v13  ;;  %v1304_v39 = vld [vmem:[%s1494_s0 + $0x30] sm:$0xff]  ;;  %v1311_v40 = vld [vmem:[%s1494_s0 + $0x38] sm:$0xff]  ;;  %v1318_v41 = vld [vmem:[%s1494_s0 + $0x40] sm:$0xff] }
  0x1b   :  { %88 = vmatpush1.msra.mxu0 %v61_v14  ;;  %v1325_v42 = vld [vmem:[%s1494_s0 + $0x48] sm:$0xff]  ;;  %v1332_v43 = vld [vmem:[%s1494_s0 + $0x50] sm:$0xff]  ;;  %v1339_v44 = vld [vmem:[%s1494_s0 + $0x58] sm:$0xff] }
  0x1c   :  { %89 = vmatprep.subr.mxu0 %v60_v15  ;;  %v437_v45 = vld [vmem:[%s1496_s2 + $0x78] sm:$0xff]  ;;  %v436_v46 = vld [vmem:[%s1496_s2 + $0x70] sm:$0xff]  ;;  %v435_v47 = vld [vmem:[%s1496_s2 + $0x68] sm:$0xff] }
  0x1d   :  { %90 = vmatpush1.msra.mxu0 %v59_v16  ;;  %v434_v48 = vld [vmem:[%s1496_s2 + $0x60] sm:$0xff]  ;;  %v433_v49 = vld [vmem:[%s1496_s2 + $0x58] sm:$0xff]  ;;  %v432_v50 = vld [vmem:[%s1496_s2 + $0x50] sm:$0xff] }
  0x1e   :  { %91 = vmatprep.subr.mxu0 %v58_v17  ;;  %v431_v51 = vld [vmem:[%s1496_s2 + $0x48] sm:$0xff]  ;;  %v430_v52 = vld [vmem:[%s1496_s2 + $0x40] sm:$0xff]  ;;  %v429_v54 = vld [vmem:[%s1496_s2 + $0x38] sm:$0xff] }
  0x1f   :  { %92 = vmatpush1.msra.mxu0 %v57_v18  ;;  %v428_v56 = vld [vmem:[%s1496_s2 + $0x30] sm:$0xff]  ;;  %v427_v58 = vld [vmem:[%s1496_s2 + $0x28] sm:$0xff]  ;;  %v426_v60 = vld [vmem:[%s1496_s2 + $0x20] sm:$0xff] }
  0x20   :  { %93 = vmatprep.subr.mxu0 %v56_v19  ;;  %v425_v62 = vld [vmem:[%s1496_s2 + $0x18] sm:$0xff]  ;;  %v423_v2 = vld [vmem:[%s1496_s2 + $0x8] sm:$0xff]  ;;  %v422_v4 = vld [vmem:[%s1496_s2] sm:$0xff] }
  0x21   :  { %94 = vmatpush1.msra.mxu0 %v55_v20 }
  0x22   :  { %95 = vmatprep.subr.mxu0 %v54_v21 }
  0x23   :  { %96 = vmatpush1.msra.mxu0 %v53_v22 }
  0x24   :  { %97 = vmatprep.subr.mxu0 %v52_v23 }
  0x25   :  { %98 = vmatpush1.msra.mxu0 %v51_v24 }
  0x26   :  { %99 = vmatprep.subr.mxu0 %v50_v25 }
  0x27   :  { %100 = vmatpush1.msra.mxu0 %v49_v26 }
  0x28   :  { %101 = vmatprep.subr.mxu0 %v48_v27 }
  0x29   :  { %102 = vmatpush1.msra.mxu0 %v47_v28 }
  0x2a   :  { %103 = vmatprep.subr.mxu0 %v46_v29 }
  0x2b   :  { %104 = vmatpush1.msra.mxu0 %v45_v30 }
  0x2c   :  { %105 = vmatprep.subr.mxu0 %v44_v31 }
  0x2d   :  { %106 = vmatpush1.msra.mxu0 %v43_v32 }
  0x2e   :  { %140 = vmatmul.mubr.f32.vlgmr.msra.gmra.mxu0 %v31_v33  ;;  %967 = vmatprep.subr.mxu0 %v437_v45 }
  0x2f   :  { %145 = vmatprep.mubr.f32.mxu0 %v1136_v0  ;;  %968 = vmatpush3.msra.mxu0 %v437_v45 }
  0x30   :  { %969 = vmatprep.subr.mxu0 %v436_v46 }
  0x31   :  { %970 = vmatpush3.msra.mxu0 %v436_v46  ;;  %v216_v46 = vld [vmem:[#allocation2 + $0x20] sm:$0xff] }
  0x32   :  { %146 = vmatmul.mubr.f32.gmra.mxu0 %v1269_v34  ;;  %971 = vmatprep.subr.mxu0 %v435_v47 }
  0x33   :  { %151 = vmatprep.mubr.f32.mxu0 %v1136_v0  ;;  %972 = vmatpush3.msra.mxu0 %v435_v47 }
  0x34   :  { %973 = vmatprep.subr.mxu0 %v434_v48 }
  0x35   :  { %974 = vmatpush3.msra.mxu0 %v434_v48 }
  0x36   :  { %152 = vmatmul.mubr.f32.gmra.mxu0 %v1276_v35  ;;  %975 = vmatprep.subr.mxu0 %v433_v49 }
  0x37   :  { %157 = vmatprep.mubr.f32.mxu0 %v1136_v0  ;;  %976 = vmatpush3.msra.mxu0 %v433_v49 }
  0x38   :  { %977 = vmatprep.subr.mxu0 %v432_v50 }
  0x39   :  { %978 = vmatpush3.msra.mxu0 %v432_v50  ;;  %v217_v50 = vld [vmem:[#allocation2 + $0x28] sm:$0xff] }
  0x3a   :  { %158 = vmatmul.mubr.f32.gmra.mxu0 %v1283_v36  ;;  %979 = vmatprep.subr.mxu0 %v431_v51 }
  0x3b   :  { %163 = vmatprep.mubr.f32.mxu0 %v1136_v0  ;;  %980 = vmatpush3.msra.mxu0 %v431_v51 }
  0x3c   :  { %981 = vmatprep.subr.mxu0 %v430_v52 }
  0x3d   :  { %982 = vmatpush3.msra.mxu0 %v430_v52 }
  0x3e   :  { %164 = vmatmul.mubr.f32.gmra.mxu0 %v1290_v37  ;;  %983 = vmatprep.subr.mxu0 %v429_v54 }
  0x3f   :  { %169 = vmatprep.mubr.f32.mxu0 %v1136_v0  ;;  %984 = vmatpush3.msra.mxu0 %v429_v54  ;;  %v218_v54 = vld [vmem:[#allocation2 + $0x30] sm:$0xff] }
  0x40   :  { %985 = vmatprep.subr.mxu0 %v428_v56 }
  0x41   :  { %986 = vmatpush3.msra.mxu0 %v428_v56 }
  0x42   :  { %170 = vmatmul.mubr.f32.gmra.mxu0 %v1297_v38  ;;  %987 = vmatprep.subr.mxu0 %v427_v58 }
  0x43   :  { %175 = vmatprep.mubr.f32.mxu0 %v1136_v0  ;;  %988 = vmatpush3.msra.mxu0 %v427_v58  ;;  %v219_v58 = vld [vmem:[#allocation2 + $0x38] sm:$0xff] }
  0x44   :  { %989 = vmatprep.subr.mxu0 %v426_v60 }
  0x45   :  { %990 = vmatpush3.msra.mxu0 %v426_v60 }
  0x46   :  { %176 = vmatmul.mubr.f32.gmra.mxu0 %v1304_v39  ;;  %991 = vmatprep.subr.mxu0 %v425_v62 }
  0x47   :  { %181 = vmatprep.mubr.f32.mxu0 %v1136_v0  ;;  %992 = vmatpush3.msra.mxu0 %v425_v62  ;;  %v220_v62 = vld [vmem:[#allocation2 + $0x40] sm:$0xff] }
  0x4a   :  { %182 = vmatmul.mubr.f32.gmra.mxu0 %v1311_v40 }
  0x4b   :  { %187 = vmatprep.mubr.f32.mxu0 %v1136_v0 }
  0x4e   :  { %188 = vmatmul.mubr.f32.gmra.mxu0 %v1318_v41 }
  0x4f   :  { %193 = vmatprep.mubr.f32.mxu0 %v1136_v0 }
  0x52   :  { %194 = vmatmul.mubr.f32.gmra.mxu0 %v1325_v42 }
  0x53   :  { %199 = vmatprep.mubr.f32.mxu0 %v1136_v0 }
  0x56   :  { %200 = vmatmul.mubr.f32.gmra.mxu0 %v1332_v43 }
  0x57   :  { %205 = vmatprep.mubr.f32.mxu0 %v1136_v0  ;;  %v424_v0 = vld [vmem:[%s1496_s2 + $0x10] sm:$0xff] }
  0x58   :  { %993 = vmatprep.subr.mxu0 %v424_v0 }
  0x59   :  { %994 = vmatpush3.msra.mxu0 %v424_v0 }
  0x5a   :  { %206 = vmatmul.mubr.f32.gmra.mxu0 %v1339_v44  ;;  %995 = vmatprep.subr.mxu0 %v423_v2 }
  0x5b   :  { %999 = vmatprep.mubr.f32.mxu0 %v31_v33  ;;  %996 = vmatpush3.msra.mxu0 %v423_v2  ;;  %v221_v2 = vld [vmem:[#allocation2 + $0x48] sm:$0xff] }
  0x5c   :  { %997 = vmatprep.subr.mxu0 %v422_v4 }
  0x5d   :  { %998 = vmatpush3.msra.mxu0 %v422_v4 }
  0x5e   :  { %1000 = vmatmul.mubr.f32.vlgmr.msra.gmra.mxu0 %v1269_v34  ;;  %v212_v34 = vld [vmem:[#allocation2] sm:$0xff] }
  0x5f   :  { %1002 = vmatprep.mubr.f32.mxu0 %v1276_v35  ;;  %v213_v35 = vld [vmem:[#allocation2 + $0x8] sm:$0xff] }
  0x62   :  { %1003 = vmatmul.mubr.f32.gmra.mxu0 %v1283_v36 }
  0x63   :  { %1005 = vmatprep.mubr.f32.mxu0 %v1290_v37 }
  0x66   :  { %1006 = vmatmul.mubr.f32.gmra.mxu0 %v1297_v38 }
  0x67   :  { %1008 = vmatprep.mubr.f32.mxu0 %v1304_v39  ;;  %v214_v39 = vld [vmem:[#allocation2 + $0x10] sm:$0xff] }
  0x6a   :  { %1009 = vmatmul.mubr.f32.gmra.mxu0 %v1311_v40 }
  0x6b   :  { %1011 = vmatprep.mubr.f32.mxu0 %v1318_v41 }
  0x6e   :  { %1012 = vmatmul.mubr.f32.gmra.mxu0 %v1325_v42  ;;  %v215_v42 = vld [vmem:[#allocation2 + $0x18] sm:$0xff] }
  0x6f   :  { %1014 = vmatprep.mubr.f32.mxu0 %v1332_v43 }
  0x72   :  { %1015 = vmatmul.mubr.f32.gmra.mxu0 %v1339_v44 }
  0xee   :  { %v141_v53 = vpop.f32.mrf.mxu0 }
  0xef   :  { %949 = vmatprep.mubr.f32.mxu1 %v141_v53 }
  0xf0   :  { %v1369_v55 = vpop.f32.mrf.mxu0 }
  0xf2   :  { %v1374_v57 = vpop.f32.mrf.mxu0 }
  0xf4   :  { %v1379_v59 = vpop.f32.mrf.mxu0 }
  0xf6   :  { %v1384_v61 = vpop.f32.mrf.mxu0 }
  0xf8   :  { %v155_v63 = vpop.f32.mrf.mxu0 }
  0xfa   :  { %v1392_v1 = vpop.f32.mrf.mxu0 }
  0xfc   :  { %v161_v3 = vpop.f32.mrf.mxu0 }
  0xfe   :  { %v165_v5 = vpop.f32.mrf.mxu0 }
 0x100   :  { %v167_v6 = vpop.f32.mrf.mxu0 }
 0x102   :  { %v171_v7 = vpop.f32.mrf.mxu0 }
 0x104   :  { %v173_v8 = vpop.f32.mrf.mxu0 }
 0x106   :  { %v177_v9 = vpop.f32.mrf.mxu0 }
 0x108   :  { %v179_v10 = vpop.f32.mrf.mxu0 }
 0x10a   :  { %v183_v11 = vpop.f32.mrf.mxu0 }
 0x10c   :  { %v185_v12 = vpop.f32.mrf.mxu0 }
 0x10e   :  { %v189_v13 = vpop.f32.mrf.mxu0 }
 0x110   :  { %v191_v14 = vpop.f32.mrf.mxu0 }
 0x112   :  { %v195_v15 = vpop.f32.mrf.mxu0 }
 0x114   :  { %v197_v16 = vpop.f32.mrf.mxu0 }
 0x116   :  { %v201_v17 = vpop.f32.mrf.mxu0 }
 0x118   :  { %v203_v18 = vpop.f32.mrf.mxu0 }
 0x11a   :  { %v207_v19 = vpop.f32.mrf.mxu0 }
 0x11c   :  { %v209_v20 = vpop.f32.mrf.mxu0 }
 0x11d   :  { %925 = vmatprep.subr.mxu1 %v209_v20 }
 0x11e   :  { %926 = vmatpush3.xpose.msra.mxu1 %v209_v20  ;;  %v1001_v21 = vpop.f32.mrf.mxu0 }
 0x11f   :  { %927 = vmatprep.subr.mxu1 %v203_v18 }
 0x120   :  { %v504_v22 = vpop.f32.mrf.mxu0 }
 0x122   :  { %928 = vmatpush3.xpose.msra.mxu1 %v203_v18  ;;  %v1004_v23 = vpop.f32.mrf.mxu0 }
 0x123   :  { %929 = vmatprep.subr.mxu1 %v197_v16 }
 0x124   :  { %v514_v24 = vpop.f32.mrf.mxu0 }
 0x126   :  { %930 = vmatpush3.xpose.msra.mxu1 %v197_v16  ;;  %v1007_v25 = vpop.f32.mrf.mxu0 }
 0x127   :  { %931 = vmatprep.subr.mxu1 %v191_v14 }
 0x128   :  { %v524_v26 = vpop.f32.mrf.mxu0 }
 0x12a   :  { %932 = vmatpush3.xpose.msra.mxu1 %v191_v14  ;;  %v1010_v27 = vpop.f32.mrf.mxu0 }
 0x12b   :  { %933 = vmatprep.subr.mxu1 %v185_v12 }
 0x12c   :  { %v534_v28 = vpop.f32.mrf.mxu0 }
 0x12e   :  { %934 = vmatpush3.xpose.msra.mxu1 %v185_v12  ;;  %v1013_v29 = vpop.f32.mrf.mxu0 }
 0x12f   :  { %935 = vmatprep.subr.mxu1 %v179_v10 }
 0x130   :  { %v544_v30 = vpop.f32.mrf.mxu0 }
 0x132   :  { %936 = vmatpush3.xpose.msra.mxu1 %v179_v10  ;;  %v1016_v31 = vpop.f32.mrf.mxu0  ;;  %v223_v10 = vld [vmem:[#allocation2 + $0x58] sm:$0xff] }
 0x133   :  { %937 = vmatprep.subr.mxu1 %v173_v8 }
 0x134   :  { %v554_v32 = vpop.f32.mrf.mxu0 }
 0x136   :  { %938 = vmatpush3.xpose.msra.mxu1 %v173_v8 }
 0x137   :  { %939 = vmatprep.subr.mxu1 %v167_v6 }
 0x13a   :  { %940 = vmatpush3.xpose.msra.mxu1 %v167_v6  ;;  %v222_v6 = vld [vmem:[#allocation2 + $0x50] sm:$0xff] }
 0x13b   :  { %941 = vmatprep.subr.mxu1 %v161_v3 }
 0x13e   :  { %942 = vmatpush3.xpose.msra.mxu1 %v161_v3 }
 0x13f   :  { %943 = vmatprep.subr.mxu1 %v155_v63 }
 0x142   :  { %944 = vmatpush3.xpose.msra.mxu1 %v155_v63 }
 0x143   :  { %945 = vmatprep.subr.mxu1 %v1379_v59 }
 0x146   :  { %946 = vmatpush3.xpose.msra.mxu1 %v1379_v59 }
 0x147   :  { %947 = vmatprep.subr.mxu1 %v1369_v55 }
 0x14a   :  { %948 = vmatpush3.xpose.msra.mxu1 %v1369_v55 }
 0x14b   :  { %1017 = vmatprep.subr.mxu1 %v1016_v31 }
 0x14d   :  { %950 = vmatmul.mubr.f32.vlgmr.msra.gmra.mxu1 %v1374_v57 }
 0x14e   :  { %952 = vmatprep.mubr.f32.mxu1 %v1384_v61  ;;  %1018 = vmatpush3.msra.mxu1 %v1016_v31 }
 0x14f   :  { %1019 = vmatprep.subr.mxu1 %v554_v32 }
 0x150   :  { %1020 = vmatpush3.msra.mxu1 %v554_v32 }
 0x151   :  { %953 = vmatmul.mubr.f32.gmra.mxu1 %v1392_v1  ;;  %1021 = vmatprep.subr.mxu1 %v1013_v29 }
 0x152   :  { %955 = vmatprep.mubr.f32.mxu1 %v165_v5  ;;  %1022 = vmatpush3.msra.mxu1 %v1013_v29 }
 0x153   :  { %1023 = vmatprep.subr.mxu1 %v544_v30 }
 0x154   :  { %1024 = vmatpush3.msra.mxu1 %v544_v30 }
 0x155   :  { %956 = vmatmul.mubr.f32.gmra.mxu1 %v171_v7  ;;  %1025 = vmatprep.subr.mxu1 %v1010_v27 }
 0x156   :  { %958 = vmatprep.mubr.f32.mxu1 %v177_v9  ;;  %1026 = vmatpush3.msra.mxu1 %v1010_v27 }
 0x157   :  { %1027 = vmatprep.subr.mxu1 %v534_v28 }
 0x158   :  { %1028 = vmatpush3.msra.mxu1 %v534_v28 }
 0x159   :  { %959 = vmatmul.mubr.f32.gmra.mxu1 %v183_v11  ;;  %1029 = vmatprep.subr.mxu1 %v1007_v25 }
 0x15a   :  { %961 = vmatprep.mubr.f32.mxu1 %v189_v13  ;;  %1030 = vmatpush3.msra.mxu1 %v1007_v25 }
 0x15b   :  { %1031 = vmatprep.subr.mxu1 %v524_v26 }
 0x15c   :  { %1032 = vmatpush3.msra.mxu1 %v524_v26 }
 0x15d   :  { %962 = vmatmul.mubr.f32.gmra.mxu1 %v195_v15  ;;  %1033 = vmatprep.subr.mxu1 %v1004_v23 }
 0x15e   :  { %964 = vmatprep.mubr.f32.mxu1 %v201_v17  ;;  %1034 = vmatpush3.msra.mxu1 %v1004_v23 }
 0x15f   :  { %1035 = vmatprep.subr.mxu1 %v514_v24 }
 0x160   :  { %1036 = vmatpush3.msra.mxu1 %v514_v24 }
 0x161   :  { %965 = vmatmul.mubr.f32.gmra.mxu1 %v207_v19  ;;  %1037 = vmatprep.subr.mxu1 %v1001_v21 }
 0x162   :  { %1038 = vmatpush3.msra.mxu1 %v1001_v21 }
 0x163   :  { %1039 = vmatprep.subr.mxu1 %v504_v22 }
 0x164   :  { %1040 = vmatpush3.msra.mxu1 %v504_v22 }
 0x20d   :  { %v951_v33 = vpop.f32.mrf.mxu1 }
 0x20e   :  { %v296_v40 = vadd.f32 %v951_v33, %v213_v35 }
 0x20f   :  { %v290_v36 = vpop.f32.mrf.mxu1 }
 0x210   :  { %v291_v37 = vadd.f32 %v290_v36, %v212_v34  ;;  %v353_v49 = vsel %vm349_vm0, %v296_v40, -inf }
 0x211   :  { %v954_v38 = vpop.f32.mrf.mxu1 }
 0x212   :  { %v350_v41 = vsel %vm349_vm0, %v291_v37, -inf  ;;  %v306_v47 = vadd.f32 %v954_v38, %v215_v42 }
 0x213   :  { %v300_v43 = vpop.f32.mrf.mxu1  ;;  %351 = vmax.xlane.f32.xlu0 %v350_v41 }
 0x214   :  { %v301_v44 = vadd.f32 %v300_v43, %v214_v39  ;;  %v359_v56 = vsel %vm349_vm0, %v306_v47, -inf }
 0x215   :  { %v957_v45 = vpop.f32.mrf.mxu1 }
 0x216   :  { %v356_v48 = vsel %vm349_vm0, %v301_v44, -inf  ;;  %v316_v55 = vadd.f32 %v957_v45, %v217_v50 }
 0x217   :  { %v310_v51 = vpop.f32.mrf.mxu1  ;;  %357 = vmax.xlane.f32.xlu1 %v356_v48  ;;  %354 = vmax.xlane.f32.xlu0 %v353_v49 }
 0x218   :  { %v311_v52 = vadd.f32 %v310_v51, %v216_v46  ;;  %v365_v0 = vsel %vm349_vm0, %v316_v55, -inf }
 0x219   :  { %v960_v53 = vpop.f32.mrf.mxu1 }
 0x21a   :  { %v362_v57 = vsel %vm349_vm0, %v311_v52, -inf  ;;  %v326_v63 = vadd.f32 %v960_v53, %v219_v58 }
 0x21b   :  { %v320_v59 = vpop.f32.mrf.mxu1  ;;  %360 = vmax.xlane.f32.xlu1 %v359_v56  ;;  %363 = vmax.xlane.f32.xlu0 %v362_v57 }
 0x21c   :  { %v321_v60 = vadd.f32 %v320_v59, %v218_v54  ;;  %v371_v8 = vsel %vm349_vm0, %v326_v63, -inf }
 0x21d   :  { %v963_v61 = vpop.f32.mrf.mxu1 }
 0x21e   :  { %v368_v1 = vsel %vm349_vm0, %v321_v60, -inf  ;;  %v336_v7 = vadd.f32 %v963_v61, %v221_v2 }
 0x21f   :  { %v330_v3 = vpop.f32.mrf.mxu1  ;;  %366 = vmax.xlane.f32.xlu1 %v365_v0  ;;  %369 = vmax.xlane.f32.xlu0 %v368_v1 }
 0x220   :  { %v331_v4 = vadd.f32 %v330_v3, %v220_v62  ;;  %v377_v14 = vsel %vm349_vm0, %v336_v7, -inf }
 0x221   :  { %v966_v5 = vpop.f32.mrf.mxu1 }
 0x222   :  { %v374_v9 = vsel %vm349_vm0, %v331_v4, -inf  ;;  %v1427_v13 = vadd.f32 %v966_v5, %v223_v10 }
 0x223   :  { %v340_v11 = vpop.f32.mrf.mxu1  ;;  %372 = vmax.xlane.f32.xlu1 %v371_v8  ;;  %375 = vmax.xlane.f32.xlu0 %v374_v9 }
 0x224   :  { %v341_v12 = vadd.f32 %v340_v11, %v222_v6  ;;  %v383_v16 = vsel %vm349_vm0, %v1427_v13, -inf }
 0x226   :  { %v380_v15 = vsel %vm349_vm0, %v341_v12, -inf }
 0x227   :  { %378 = vmax.xlane.f32.xlu1 %v377_v14  ;;  %381 = vmax.xlane.f32.xlu0 %v380_v15 }
 0x22b   :  { %384 = vmax.xlane.f32.xlu1 %v383_v16 }
 0x29c   :  { %v352_v17 = vpop.xlane.xlu0 %351 }
 0x29d   :  { %v386_v18 = vsub.f32 %v291_v37, %v352_v17 }
 0x29f   :  { %v398_v19 = vmul.f32 1.442695, %v386_v18 }
 0x2a0   :  { %v358_v20 = vpop.xlane.xlu1 %357  ;;  %v355_v21 = vpop.xlane.xlu0 %354 }
 0x2a1   :  { %1063 = vpow2.f32 %v398_v19  ;;  %v388_v22 = vsub.f32 %v301_v44, %v358_v20  ;;  %v387_v23 = vsub.f32 %v296_v40, %v355_v21 }
 0x2a3   :  { %v402_v24 = vmul.f32 1.442695, %v388_v22  ;;  %v400_v25 = vmul.f32 1.442695, %v387_v23 }
 0x2a4   :  { %v361_v26 = vpop.xlane.xlu1 %360  ;;  %v364_v27 = vpop.xlane.xlu0 %363 }
 0x2a5   :  { %1065 = vpow2.f32 %v402_v24  ;;  %v389_v28 = vsub.f32 %v306_v47, %v361_v26  ;;  %v390_v29 = vsub.f32 %v311_v52, %v364_v27 }
 0x2a6   :  { %1067 = vpow2.f32 %v400_v25 }
 0x2a7   :  { %v404_v30 = vmul.f32 1.442695, %v389_v28  ;;  %v406_v31 = vmul.f32 1.442695, %v390_v29 }
 0x2a8   :  { %v367_v32 = vpop.xlane.xlu1 %366  ;;  %v370_v33 = vpop.xlane.xlu0 %369 }
 0x2a9   :  { %1069 = vpow2.f32 %v404_v30  ;;  %v391_v34 = vsub.f32 %v316_v55, %v367_v32  ;;  %v392_v35 = vsub.f32 %v321_v60, %v370_v33 }
 0x2aa   :  { %1071 = vpow2.f32 %v406_v31 }
 0x2ab   :  { %v408_v36 = vmul.f32 1.442695, %v391_v34  ;;  %v410_v37 = vmul.f32 1.442695, %v392_v35 }
 0x2ac   :  { %v373_v38 = vpop.xlane.xlu1 %372  ;;  %v376_v39 = vpop.xlane.xlu0 %375 }
 0x2ad   :  { %1073 = vpow2.f32 %v408_v36  ;;  %v393_v40 = vsub.f32 %v326_v63, %v373_v38  ;;  %v394_v41 = vsub.f32 %v331_v4, %v376_v39 }
 0x2ae   :  { %v1064_v42 = vpop.eup %1063  ;;  %1075 = vpow2.f32 %v410_v37 }
 0x2af   :  { %v412_v43 = vmul.f32 1.442695, %v393_v40  ;;  %v414_v44 = vmul.f32 1.442695, %v394_v41  ;;  %1041 = vmatprep.mubr.msk.f32.mxu1 %vm349_vm0, %v1064_v42  ;;  %v724_v45 = vsel %vm349_vm0, %v1064_v42, 0.0 }
 0x2b0   :  { %v379_v46 = vpop.xlane.xlu1 %378  ;;  %725 = vadd.xlane.f32.xlu0 %v724_v45  ;;  %v382_v47 = vpop.xlane.xlu0 %381 }
 0x2b1   :  { %1077 = vpow2.f32 %v412_v43  ;;  %v395_v48 = vsub.f32 %v336_v7, %v379_v46  ;;  %v396_v49 = vsub.f32 %v341_v12, %v382_v47 }
 0x2b2   :  { %v1066_v50 = vpop.eup %1065  ;;  %1079 = vpow2.f32 %v414_v44 }
 0x2b3   :  { %v1068_v51 = vpop.eup %1067  ;;  %v416_v52 = vmul.f32 1.442695, %v395_v48  ;;  %v418_v53 = vmul.f32 1.442695, %v396_v49  ;;  %v730_v54 = vsel %vm349_vm0, %v1066_v50, 0.0 }
 0x2b4   :  { %1042 = vmatmul.mubr.msk.f32.vlgmr.msra.gmra.mxu1 %vm349_vm0, %v1068_v51  ;;  %v385_v55 = vpop.xlane.xlu1 %384  ;;  %731 = vadd.xlane.f32.xlu0 %v730_v54  ;;  %v727_v56 = vsel %vm349_vm0, %v1068_v51, 0.0 }
 0x2b5   :  { %1081 = vpow2.f32 %v416_v52  ;;  %v397_v57 = vsub.f32 %v1427_v13, %v385_v55  ;;  %728 = vadd.xlane.f32.xlu1 %v727_v56  ;;  %1044 = vmatprep.mubr.msk.f32.mxu1 %vm349_vm0, %v1066_v50 }
 0x2b6   :  { %v1070_v58 = vpop.eup %1069  ;;  %1083 = vpow2.f32 %v418_v53 }
 0x2b7   :  { %v1072_v59 = vpop.eup %1071  ;;  %v420_v60 = vmul.f32 1.442695, %v397_v57  ;;  %v733_v61 = vsel %vm349_vm0, %v1070_v58, 0.0 }
 0x2b8   :  { %1045 = vmatmul.mubr.msk.f32.gmra.mxu1 %vm349_vm0, %v1070_v58  ;;  %v736_v62 = vsel %vm349_vm0, %v1072_v59, 0.0 }
 0x2b9   :  { %1085 = vpow2.f32 %v420_v60  ;;  %734 = vadd.xlane.f32.xlu1 %v733_v61  ;;  %737 = vadd.xlane.f32.xlu0 %v736_v62 }
 0x2ba   :  { %v1074_v63 = vpop.eup %1073  ;;  %1047 = vmatprep.mubr.msk.f32.mxu1 %vm349_vm0, %v1072_v59 }
 0x2bb   :  { %v1076_v0 = vpop.eup %1075  ;;  %v739_v1 = vsel %vm349_vm0, %v1074_v63, 0.0 }
 0x2bc   :  { %1048 = vmatmul.mubr.msk.f32.gmra.mxu1 %vm349_vm0, %v1074_v63  ;;  %v742_v2 = vsel %vm349_vm0, %v1076_v0, 0.0 }
 0x2bd   :  { %740 = vadd.xlane.f32.xlu1 %v739_v1  ;;  %743 = vadd.xlane.f32.xlu0 %v742_v2 }
 0x2be   :  { %v1078_v3 = vpop.eup %1077  ;;  %1050 = vmatprep.mubr.msk.f32.mxu1 %vm349_vm0, %v1076_v0 }
 0x2bf   :  { %v1080_v4 = vpop.eup %1079  ;;  %v745_v5 = vsel %vm349_vm0, %v1078_v3, 0.0 }
 0x2c0   :  { %1051 = vmatmul.mubr.msk.f32.gmra.mxu1 %vm349_vm0, %v1078_v3  ;;  %v748_v6 = vsel %vm349_vm0, %v1080_v4, 0.0 }
 0x2c1   :  { %746 = vadd.xlane.f32.xlu1 %v745_v5  ;;  %749 = vadd.xlane.f32.xlu0 %v748_v6 }
 0x2c2   :  { %v1082_v7 = vpop.eup %1081  ;;  %1053 = vmatprep.mubr.msk.f32.mxu1 %vm349_vm0, %v1080_v4 }
 0x2c3   :  { %v1084_v8 = vpop.eup %1083  ;;  %v751_v9 = vsel %vm349_vm0, %v1082_v7, 0.0 }
 0x2c4   :  { %1054 = vmatmul.mubr.msk.f32.gmra.mxu1 %vm349_vm0, %v1082_v7  ;;  %v754_v10 = vsel %vm349_vm0, %v1084_v8, 0.0 }
 0x2c5   :  { %752 = vadd.xlane.f32.xlu1 %v751_v9  ;;  %755 = vadd.xlane.f32.xlu0 %v754_v10 }
 0x2c6   :  { %v1086_v11 = vpop.eup %1085  ;;  %1056 = vmatprep.mubr.msk.f32.mxu1 %vm349_vm0, %v1084_v8 }
 0x2c7   :  { %v757_v12 = vsel %vm349_vm0, %v1086_v11, 0.0 }
 0x2c8   :  { %1057 = vmatmul.mubr.msk.f32.gmra.mxu1 %vm349_vm0, %v1086_v11 }
 0x2c9   :  { %758 = vadd.xlane.f32.xlu1 %v757_v12 }
 0x339   :  { %v726_v14 = vpop.xlane.xlu0 %725 }
 0x33d   :  { %v732_v16 = vpop.xlane.xlu0 %731 }
 0x33e   :  { %v729_v13 = vpop.xlane.xlu1 %728 }
 0x33f   :  { %1087 = vrcp.f32 %v729_v13 }
 0x340   :  { %1089 = vrcp.f32 %v726_v14 }
 0x342   :  { %v735_v15 = vpop.xlane.xlu1 %734  ;;  %v738_v18 = vpop.xlane.xlu0 %737 }
 0x343   :  { %1091 = vrcp.f32 %v735_v15 }
 0x344   :  { %1093 = vrcp.f32 %v732_v16 }
 0x346   :  { %v741_v17 = vpop.xlane.xlu1 %740  ;;  %v744_v20 = vpop.xlane.xlu0 %743 }
 0x347   :  { %1095 = vrcp.f32 %v741_v17 }
 0x348   :  { %1097 = vrcp.f32 %v738_v18 }
 0x34a   :  { %v747_v19 = vpop.xlane.xlu1 %746  ;;  %v750_v23 = vpop.xlane.xlu0 %749 }
 0x34b   :  { %1099 = vrcp.f32 %v747_v19 }
 0x34c   :  { %v1088_v22 = vpop.eup %1087  ;;  %1101 = vrcp.f32 %v744_v20 }
 0x34d   :  { %v1090_v24 = vpop.eup %1089  ;;  %v773_v25 = vmul.f32 %v1088_v22, %v729_v13 }
 0x34e   :  { %v753_v21 = vpop.xlane.xlu1 %752  ;;  %v772_v28 = vmul.f32 %v1090_v24, %v726_v14  ;;  %v756_v30 = vpop.xlane.xlu0 %755 }
 0x34f   :  { %1103 = vrcp.f32 %v753_v21  ;;  %v785_v31 = vsub.f32 2.0, %v773_v25 }
 0x350   :  { %v1092_v26 = vpop.eup %1091  ;;  %1105 = vrcp.f32 %v750_v23  ;;  %v784_v34 = vsub.f32 2.0, %v772_v28 }
 0x351   :  { %v1094_v29 = vpop.eup %1093  ;;  %v775_v32 = vmul.f32 %v1092_v26, %v735_v15  ;;  %v797_v39 = vmul.f32 %v1088_v22, %v785_v31 }
 0x352   :  { %v759_v27 = vpop.xlane.xlu1 %758  ;;  %v774_v35 = vmul.f32 %v1094_v29, %v732_v16  ;;  %v796_v45 = vmul.f32 %v1090_v24, %v784_v34 }
 0x353   :  { %1107 = vrcp.f32 %v759_v27  ;;  %v787_v37 = vsub.f32 2.0, %v775_v32 }
 0x354   :  { %v1096_v33 = vpop.eup %1095  ;;  %1109 = vrcp.f32 %v756_v30  ;;  %v786_v42 = vsub.f32 2.0, %v774_v35 }
 0x355   :  { %v1098_v36 = vpop.eup %1097  ;;  %v777_v38 = vmul.f32 %v1096_v33, %v741_v17  ;;  %v799_v51 = vmul.f32 %v1092_v26, %v787_v37 }
 0x356   :  { %v776_v43 = vmul.f32 %v1098_v36, %v738_v18  ;;  %v798_v57 = vmul.f32 %v1094_v29, %v786_v42 }
 0x357   :  { %v789_v48 = vsub.f32 2.0, %v777_v38 }
 0x358   :  { %v1100_v40 = vpop.eup %1099  ;;  %v788_v54 = vsub.f32 2.0, %v776_v43 }
 0x359   :  { %v1102_v46 = vpop.eup %1101  ;;  %v779_v49 = vmul.f32 %v1100_v40, %v747_v19  ;;  %v801_v63 = vmul.f32 %v1096_v33, %v789_v48 }
 0x35a   :  { %v778_v55 = vmul.f32 %v1102_v46, %v744_v20  ;;  %v800_v5 = vmul.f32 %v1098_v36, %v788_v54 }
 0x35b   :  { %v791_v60 = vsub.f32 2.0, %v779_v49 }
 0x35c   :  { %v1104_v52 = vpop.eup %1103  ;;  %v790_v2 = vsub.f32 2.0, %v778_v55 }
 0x35d   :  { %v1106_v58 = vpop.eup %1105  ;;  %v781_v61 = vmul.f32 %v1104_v52, %v753_v21  ;;  %v803_v11 = vmul.f32 %v1100_v40, %v791_v60 }
 0x35e   :  { %v780_v3 = vmul.f32 %v1106_v58, %v750_v23  ;;  %v802_v16 = vmul.f32 %v1102_v46, %v790_v2 }
 0x35f   :  { %v793_v8 = vsub.f32 2.0, %v781_v61 }
 0x360   :  { %v1108_v0 = vpop.eup %1107  ;;  %v792_v13 = vsub.f32 2.0, %v780_v3 }
 0x361   :  { %v1110_v6 = vpop.eup %1109  ;;  %v783_v9 = vmul.f32 %v1108_v0, %v759_v27  ;;  %v805_v20 = vmul.f32 %v1104_v52, %v793_v8 }
 0x362   :  { %v782_v14 = vmul.f32 %v1110_v6, %v756_v30  ;;  %v804_v24 = vmul.f32 %v1106_v58, %v792_v13 }
 0x363   :  { %v795_v18 = vsub.f32 2.0, %v783_v9 }
 0x364   :  { %v794_v22 = vsub.f32 2.0, %v782_v14 }
 0x365   :  { %v807_v27 = vmul.f32 %v1108_v0, %v795_v18 }
 0x366   :  { %v806_v30 = vmul.f32 %v1110_v6, %v794_v22 }
 0x374   :  { %v1043_v41 = vpop.f32.mrf.mxu1 }
 0x375   :  { %v809_v44 = vmul.f32 %v1043_v41, %v797_v39 }
 0x376   :  { %v665_v47 = vpop.f32.mrf.mxu1 }
 0x377   :  { %821 = vst [vmem:[%s1498_s4 + $0x8] sm:$0xff] %v809_v44  ;;  %v808_v50 = vmul.f32 %v796_v45, %v665_v47 }
 0x378   :  { %v1046_v53 = vpop.f32.mrf.mxu1 }
 0x379   :  { %820 = vst [vmem:[%s1498_s4] sm:$0xff] %v808_v50  ;;  %v811_v56 = vmul.f32 %v1046_v53, %v799_v51 }
 0x37a   :  { %v675_v59 = vpop.f32.mrf.mxu1 }
 0x37b   :  { %823 = vst [vmem:[%s1498_s4 + $0x18] sm:$0xff] %v811_v56  ;;  %v810_v62 = vmul.f32 %v798_v57, %v675_v59 }
 0x37c   :  { %v1049_v1 = vpop.f32.mrf.mxu1 }
 0x37d   :  { %822 = vst [vmem:[%s1498_s4 + $0x10] sm:$0xff] %v810_v62  ;;  %v813_v4 = vmul.f32 %v1049_v1, %v801_v63 }
 0x37e   :  { %v685_v7 = vpop.f32.mrf.mxu1 }
 0x37f   :  { %825 = vst [vmem:[%s1498_s4 + $0x28] sm:$0xff] %v813_v4  ;;  %v812_v10 = vmul.f32 %v800_v5, %v685_v7 }
 0x380   :  { %v1052_v12 = vpop.f32.mrf.mxu1 }
 0x381   :  { %824 = vst [vmem:[%s1498_s4 + $0x20] sm:$0xff] %v812_v10  ;;  %v815_v15 = vmul.f32 %v1052_v12, %v803_v11 }
 0x382   :  { %v695_v17 = vpop.f32.mrf.mxu1 }
 0x383   :  { %827 = vst [vmem:[%s1498_s4 + $0x38] sm:$0xff] %v815_v15  ;;  %v814_v19 = vmul.f32 %v802_v16, %v695_v17 }
 0x384   :  { %v1055_v21 = vpop.f32.mrf.mxu1 }
 0x385   :  { %826 = vst [vmem:[%s1498_s4 + $0x30] sm:$0xff] %v814_v19  ;;  %v817_v23 = vmul.f32 %v1055_v21, %v805_v20 }
 0x386   :  { %v705_v25 = vpop.f32.mrf.mxu1 }
 0x387   :  { %829 = vst [vmem:[%s1498_s4 + $0x48] sm:$0xff] %v817_v23  ;;  %v816_v26 = vmul.f32 %v804_v24, %v705_v25 }
 0x388   :  { %v1058_v28 = vpop.f32.mrf.mxu1 }
 0x389   :  { %828 = vst [vmem:[%s1498_s4 + $0x40] sm:$0xff] %v816_v26  ;;  %v819_v29 = vmul.f32 %v1058_v28, %v807_v27 }
 0x38a   :  { %v715_v31 = vpop.f32.mrf.mxu1 }
 0x38b   :  { %831 = vst [vmem:[%s1498_s4 + $0x58] sm:$0xff] %v819_v29  ;;  %v818_v32 = vmul.f32 %v806_v30, %v715_v31 }
 0x38d   :  { %830 = vst [vmem:[%s1498_s4 + $0x50] sm:$0xff] %v818_v32 }
 0x38e   :  { %836 = vsyncpa [#allocation3], 1 }

</bundles_post_ra>
